<compile_context>
chip_gen: v7x
topology: tpu7x:2x2x1
jax: 0.10.0
libtpu: 0.0.40
codegen_flags: <defaults>
</compile_context>

<pallas_src>
import functools

import jax
import jax.numpy as jnp
from jax.experimental import pallas as pl
from jax.experimental.pallas import tpu as pltpu


def _round_up(n: int, m: int) -> int:
    return ((n + m - 1) // m) * m


def _mlp_kernel(x_ref, w1_ref, b1_ref, w2_ref, b2_ref, w3_ref, b3_ref, o_ref):
    """Feature-major 3-layer MLP; every operand is (features, batch_tile)."""
    cdt = w1_ref.dtype  # MXU operand dtype (f32 or bf16); accumulation is f32
    # fc1 + ReLU
    h = jnp.dot(w1_ref[...], x_ref[...], preferred_element_type=jnp.float32)
    h = jnp.maximum(h + b1_ref[...], 0.0)
    # fc2b + ReLU
    h = jnp.dot(w2_ref[...], h.astype(cdt), preferred_element_type=jnp.float32)
    h = jnp.maximum(h + b2_ref[...], 0.0)
    # fc3
    h = jnp.dot(w3_ref[...], h.astype(cdt), preferred_element_type=jnp.float32)
    o_ref[...] = (h + b3_ref[...]).astype(o_ref.dtype)


@functools.partial(jax.jit, static_argnames=("tb",))
def simplenet_forward(x, w1, b1c, w2b, b2c, w3, b3c, *, tb=4096):
    """x: (B, ninput) as in PyTorch.  Params must come from prep_params()."""
    B, ninput = x.shape
    nh1 = w1.shape[0]
    nh2 = w2b.shape[0]
    nout = w3.shape[0]

    # Layout plumbing (wrapper-side): put the batch dimension on lanes.
    x_t = x.astype(w1.dtype).T                       # (ninput, B)
    tb = min(tb, _round_up(B, 128))                  # lane tile, multiple of 128
    Bp = _round_up(B, tb)
    if Bp != B:
        x_t = jnp.pad(x_t, ((0, 0), (0, Bp - B)))    # zero-pad last tile
    n_tiles = Bp // tb

    pinned = lambda i: (0, 0)                        # weights/biases stay resident
    witem = jnp.dtype(w1.dtype).itemsize
    cost = pl.CostEstimate(
        flops=2 * Bp * (nh1 * ninput + nh2 * nh1 + nout * nh2),
        transcendentals=0,
        bytes_accessed=(x_t.size + w1.size + w2b.size + w3.size) * witem
        + (b1c.size + b2c.size + b3c.size + nout * Bp) * 4,
    )

    out_t = pl.pallas_call(
        _mlp_kernel,
        out_shape=jax.ShapeDtypeStruct((nout, Bp), jnp.float32),
        grid=(n_tiles,),
        in_specs=[
            pl.BlockSpec((ninput, tb), lambda i: (0, i)),   # x tile (streamed)
            pl.BlockSpec((nh1, ninput), pinned),            # fc1  W (out, in)
            pl.BlockSpec((nh1, 1), pinned),                 # fc1  b (out, 1)
            pl.BlockSpec((nh2, nh1), pinned),               # fc2b W
            pl.BlockSpec((nh2, 1), pinned),                 # fc2b b
            pl.BlockSpec((nout, nh2), pinned),              # fc3  W
            pl.BlockSpec((nout, 1), pinned),                # fc3  b
        ],
        out_specs=pl.BlockSpec((nout, tb), lambda i: (0, i)),
        compiler_params=pltpu.CompilerParams(
            dimension_semantics=("parallel",),              # v7x: 2 TCs share batch
        ),
        cost_estimate=cost,
    )(x_t, w1, b1c, w2b, b2c, w3, b3c)

    return out_t[:, :B].T                                   # back to (B, noutput)


def init_params(key, ninput, noutput, nhidden1, nhidden2):
    """PyTorch nn.Linear-style init; returns params in PyTorch (out, in) layout."""
    def linear(key, fan_in, fan_out):
        kw, kb = jax.random.split(key)
        bound = 1.0 / jnp.sqrt(fan_in)
        w = jax.random.uniform(kw, (fan_out, fan_in), jnp.float32, -bound, bound)
        b = jax.random.uniform(kb, (fan_out,), jnp.float32, -bound, bound)
        return w, b

    k1, k2, k3 = jax.random.split(key, 3)
    w1, b1 = linear(k1, ninput, nhidden1)       # fc1
    w2b, b2b = linear(k2, nhidden1, nhidden2)   # fc2b
    w3, b3 = linear(k3, nhidden2, noutput)      # fc3
    return w1, b1, w2b, b2b, w3, b3


def prep_params(w1, b1, w2b, b2b, w3, b3, param_dtype=jnp.float32):
    """One-time layout prep (NOT per forward call): weights stay (out, in) --
    exactly what the feature-major W @ x needs -- and biases become (out, 1)
    columns that broadcast over the lane (batch) axis.  Pass
    param_dtype=jnp.bfloat16 to halve weight/x DMA bytes on v6e/v7x."""
    return (
        w1.astype(param_dtype), b1.reshape(-1, 1).astype(jnp.float32),
        w2b.astype(param_dtype), b2b.reshape(-1, 1).astype(jnp.float32),
        w3.astype(param_dtype), b3.reshape(-1, 1).astype(jnp.float32),
    )


def reference_forward(x, w1, b1, w2b, b2b, w3, b3):
    """Pure-JAX reference in the original PyTorch parameter layout."""
    h = jnp.maximum(x @ w1.T + b1, 0.0)
    h = jnp.maximum(h @ w2b.T + b2b, 0.0)
    return h @ w3.T + b3


def prediction(sample, prepped_params, ab_parm, Rs_parm):
    """Mirrors SimpleNet.prediction(): normalize, view(-1, 6), forward, denorm."""
    norm = (sample - ab_parm[0]) / ab_parm[1]
    batch_features = norm.reshape(-1, 6)
    out = simplenet_forward(batch_features, *prepped_params)
    return (out * Rs_parm[1] + Rs_parm[0]).flatten()


if __name__ == "__main__":
    # Shapes implied by the module: ninput=6 (see .view(-1, 6) in prediction()).
    ninput, noutput = 6, 1
    nhidden1, nhidden2 = 32, 32
    batch = 200  # small; deliberately not a multiple of 128 to exercise padding

    key = jax.random.PRNGKey(0)
    kx, kp = jax.random.split(key)
    x = jax.random.normal(kx, (batch, ninput), jnp.float32)

    torch_layout_params = init_params(kp, ninput, noutput, nhidden1, nhidden2)
    kernel_params = prep_params(*torch_layout_params)   # one-time layout prep

    out = simplenet_forward(x, *kernel_params)
    out = jax.block_until_ready(out)

    ref = reference_forward(x, *torch_layout_params)
    assert out.shape == (batch, noutput)
    assert jnp.allclose(out, ref, atol=1e-5, rtol=1e-5)

    # prediction() path: flatten -> normalize -> forward -> denormalize.
    ab_parm, Rs_parm = (0.0, 1.0), (0.0, 1.0)
    pred = prediction(x.reshape(-1), kernel_params, ab_parm, Rs_parm)
    pred = jax.block_until_ready(pred)
    assert pred.shape == (batch,)
    assert jnp.allclose(pred, ref.flatten(), atol=1e-5, rtol=1e-5)

    print("KERNEL_OK")
</pallas_src>

<mosaic_0001>
module attributes {stable_mosaic.version = 11 : i64} {
  func.func @_mlp_kernel(%arg0: i32, %arg1: memref<6x256xf32, #tpu.memory_space<vmem>>, %arg2: memref<32x6xf32, #tpu.memory_space<vmem>>, %arg3: memref<32x1xf32, #tpu.memory_space<vmem>>, %arg4: memref<32x32xf32, #tpu.memory_space<vmem>>, %arg5: memref<32x1xf32, #tpu.memory_space<vmem>>, %arg6: memref<1x32xf32, #tpu.memory_space<vmem>>, %arg7: memref<1x1xf32, #tpu.memory_space<vmem>>, %arg8: memref<1x256xf32, #tpu.memory_space<vmem>>) attributes {dimension_semantics = [#tpu.dimension_semantics<parallel>], iteration_bounds = array<i64: 1>, scalar_prefetch = 0 : i64, scratch_operands = 0 : i64, tpu.core_type = #tpu.core_type<tc>, window_params = [{transform_indices = @transform_0, window_bounds = array<i64: 6, 256>}, {pipeline_mode = #tpu.pipeline_mode<synchronous>, transform_indices = @transform_1, window_bounds = array<i64: 32, 6>}, {pipeline_mode = #tpu.pipeline_mode<synchronous>, transform_indices = @transform_2, window_bounds = array<i64: 32, 1>}, {pipeline_mode = #tpu.pipeline_mode<synchronous>, transform_indices = @transform_3, window_bounds = array<i64: 32, 32>}, {pipeline_mode = #tpu.pipeline_mode<synchronous>, transform_indices = @transform_4, window_bounds = array<i64: 32, 1>}, {pipeline_mode = #tpu.pipeline_mode<synchronous>, transform_indices = @transform_5, window_bounds = array<i64: 1, 32>}, {pipeline_mode = #tpu.pipeline_mode<synchronous>, transform_indices = @transform_6, window_bounds = array<i64: 1, 1>}, {transform_indices = @transform_7, window_bounds = array<i64: 1, 256>}]} {
    %c0 = arith.constant 0 : index
    %c0_0 = arith.constant 0 : index
    %0 = vector.load %arg2[%c0, %c0_0] : memref<32x6xf32, #tpu.memory_space<vmem>>, vector<32x6xf32>
    %c0_1 = arith.constant 0 : index
    %c0_2 = arith.constant 0 : index
    %1 = vector.load %arg1[%c0_1, %c0_2] : memref<6x256xf32, #tpu.memory_space<vmem>>, vector<6x256xf32>
    %cst = arith.constant dense<0.000000e+00> : vector<32x256xf32>
    %2 = tpu.matmul %0, %1, %cst {dimension_numbers = #tpu.dot_dimension_numbers<[1], [0], [0], [1], [0, 0, 1, 1], [], []>} : vector<32x6xf32>, vector<6x256xf32>, vector<32x256xf32> -> vector<32x256xf32>
    %c0_3 = arith.constant 0 : index
    %c0_4 = arith.constant 0 : index
    %3 = vector.load %arg3[%c0_3, %c0_4] : memref<32x1xf32, #tpu.memory_space<vmem>>, vector<32x1xf32>
    %4 = vector.broadcast %3 : vector<32x1xf32> to vector<32x256xf32>
    %5 = arith.addf %2, %4 : vector<32x256xf32>
    %cst_5 = arith.constant 0.000000e+00 : f32
    %6 = vector.broadcast %cst_5 : f32 to vector<32x256xf32>
    %7 = arith.maximumf %5, %6 : vector<32x256xf32>
    %c0_6 = arith.constant 0 : index
    %c0_7 = arith.constant 0 : index
    %8 = vector.load %arg4[%c0_6, %c0_7] : memref<32x32xf32, #tpu.memory_space<vmem>>, vector<32x32xf32>
    %cst_8 = arith.constant dense<0.000000e+00> : vector<32x256xf32>
    %9 = tpu.matmul %8, %7, %cst_8 {dimension_numbers = #tpu.dot_dimension_numbers<[1], [0], [0], [1], [0, 0, 1, 1], [], []>} : vector<32x32xf32>, vector<32x256xf32>, vector<32x256xf32> -> vector<32x256xf32>
    %c0_9 = arith.constant 0 : index
    %c0_10 = arith.constant 0 : index
    %10 = vector.load %arg5[%c0_9, %c0_10] : memref<32x1xf32, #tpu.memory_space<vmem>>, vector<32x1xf32>
    %11 = vector.broadcast %10 : vector<32x1xf32> to vector<32x256xf32>
    %12 = arith.addf %9, %11 : vector<32x256xf32>
    %cst_11 = arith.constant 0.000000e+00 : f32
    %13 = vector.broadcast %cst_11 : f32 to vector<32x256xf32>
    %14 = arith.maximumf %12, %13 : vector<32x256xf32>
    %c0_12 = arith.constant 0 : index
    %c0_13 = arith.constant 0 : index
    %15 = vector.load %arg6[%c0_12, %c0_13] : memref<1x32xf32, #tpu.memory_space<vmem>>, vector<1x32xf32>
    %cst_14 = arith.constant dense<0.000000e+00> : vector<1x256xf32>
    %16 = tpu.matmul %15, %14, %cst_14 {dimension_numbers = #tpu.dot_dimension_numbers<[1], [0], [0], [1], [0, 0, 1, 1], [], []>} : vector<1x32xf32>, vector<32x256xf32>, vector<1x256xf32> -> vector<1x256xf32>
    %c0_15 = arith.constant 0 : index
    %c0_16 = arith.constant 0 : index
    %17 = vector.load %arg7[%c0_15, %c0_16] : memref<1x1xf32, #tpu.memory_space<vmem>>, vector<1x1xf32>
    %18 = vector.broadcast %17 : vector<1x1xf32> to vector<1x256xf32>
    %19 = arith.addf %16, %18 : vector<1x256xf32>
    %c0_17 = arith.constant 0 : index
    %c0_18 = arith.constant 0 : index
    %20 = vector.load %arg8[%c0_17, %c0_18] : memref<1x256xf32, #tpu.memory_space<vmem>>, vector<1x256xf32>
    tpu.vector_store %arg8[%c0_17, %c0_18], %19 {strides = array<i32>} : memref<1x256xf32, #tpu.memory_space<vmem>>, vector<1x256xf32>,
    return
  }
  func.func @transform_0(%arg0: i32) -> (i32, i32) {
    %c0_i32 = arith.constant 0 : i32
    %c0_i32_0 = arith.constant 0 : i32
    return %c0_i32, %arg0 : i32, i32
  }
  func.func @transform_1(%arg0: i32) -> (i32, i32) {
    %c0_i32 = arith.constant 0 : i32
    %c0_i32_0 = arith.constant 0 : i32
    %c0_i32_1 = arith.constant 0 : i32
    return %c0_i32, %c0_i32_0 : i32, i32
  }
  func.func @transform_2(%arg0: i32) -> (i32, i32) {
    %c0_i32 = arith.constant 0 : i32
    %c0_i32_0 = arith.constant 0 : i32
    %c0_i32_1 = arith.constant 0 : i32
    return %c0_i32, %c0_i32_0 : i32, i32
  }
  func.func @transform_3(%arg0: i32) -> (i32, i32) {
    %c0_i32 = arith.constant 0 : i32
    %c0_i32_0 = arith.constant 0 : i32
    %c0_i32_1 = arith.constant 0 : i32
    return %c0_i32, %c0_i32_0 : i32, i32
  }
  func.func @transform_4(%arg0: i32) -> (i32, i32) {
    %c0_i32 = arith.constant 0 : i32
    %c0_i32_0 = arith.constant 0 : i32
    %c0_i32_1 = arith.constant 0 : i32
    return %c0_i32, %c0_i32_0 : i32, i32
  }
  func.func @transform_5(%arg0: i32) -> (i32, i32) {
    %c0_i32 = arith.constant 0 : i32
    %c0_i32_0 = arith.constant 0 : i32
    %c0_i32_1 = arith.constant 0 : i32
    return %c0_i32, %c0_i32_0 : i32, i32
  }
  func.func @transform_6(%arg0: i32) -> (i32, i32) {
    %c0_i32 = arith.constant 0 : i32
    %c0_i32_0 = arith.constant 0 : i32
    %c0_i32_1 = arith.constant 0 : i32
    return %c0_i32, %c0_i32_0 : i32, i32
  }
  func.func @transform_7(%arg0: i32) -> (i32, i32) {
    %c0_i32 = arith.constant 0 : i32
    %c0_i32_0 = arith.constant 0 : i32
    return %c0_i32, %arg0 : i32, i32
  }
}

</mosaic_0001>

<bundles_post_ra>
// kernel: simplenet_forward.1
= control target key start
LH: loop header
LB: loop body
LE: loop exit
PB: predicated region body
PF: predicated region fallthrough
CT: control target
= control target key end

     0   :  { %vm71_vm0 = vcmask 1045504   ;;  %v457_v2 = vmov 0.0   ;;  %vm58_vm1 = vcmask 48128   ;;  %v458_v4 = vmov 0   ;;  %s583_s0 = inlined_call_operand.vmem [shape: f32[6,256], index: 0, kind: input, shape index: {}]   ;;  %s584_s1 = inlined_call_operand.vmem [shape: f32[32,6], index: 1, kind: input, shape index: {}]   ;;  %s585_s2 = inlined_call_operand.vmem [shape: f32[32,1], index: 2, kind: input, shape index: {}]   ;;  %s586_s6 = inlined_call_operand.<no memory space> [shape: f32[1,1], index: 6, kind: input, shape index: {}]   ;;  %s587_s4 = inlined_call_operand.vmem [shape: f32[32,1], index: 4, kind: input, shape index: {}]   ;;  %s588_s3 = inlined_call_operand.vmem [shape: f32[32,32], index: 3, kind: input, shape index: {}]   ;;  %s589_s5 = inlined_call_operand.vmem [shape: f32[1,32], index: 5, kind: input, shape index: {}]   ;;  %s590_s7 = inlined_call_operand.vmem [shape: f32[1,256], index: 7, kind: output, shape index: {}]  }
   0x1   :  { %v33_v0 = vld [vmem:[%s583_s0 + $0x8] sm:$0x3f]  ;;  %v32_v1 = vld [vmem:[%s583_s0] sm:$0x3f]  ;;  %142 = vmatprep.mubr.f32.mxu0 %v457_v2  ;;  %455 = vset.pattern.permute.xlu0 %v458_v4  ;;  %v12_v5 = vstv %s586_s6  ;;  %v36_v7 = vld [vmem:[%s585_s2 + $0x10] sm:$0xff]  ;;  %vm203_vm2 = vcmask 261120  }
   0x2   :  { %v28_v3 = vld [vmem:[%s584_s1] sm:$0xff]  ;;  %425 = vmatprep.subr.msk.mxu0 %vm71_vm0, %v33_v0  ;;  %456 = vset.pattern.permute.xlu1 %v458_v4  ;;  %13 = vst [vmem:[#allocation2] sm:$0x1] %v12_v5  ;;  %v29_v8 = vld [vmem:[%s584_s1 + $0x8] sm:$0xff]  ;;  %v37_v10 = vld [vmem:[%s585_s2 + $0x18] sm:$0xff] }
   0x3   :  { %426 = vmatpush1.msk.msra.mxu0 %vm71_vm0, %v32_v1  ;;  %v34_v6 = vld [vmem:[%s585_s2] sm:$0xff]  ;;  %280 = vmatprep.mubr.f32.mxu1 %v457_v2  ;;  %v35_v9 = vld [vmem:[%s585_s2 + $0x8] sm:$0xff]  ;;  %v30_v11 = vld [vmem:[%s584_s1 + $0x10] sm:$0xff] }
   0x4   :  { %427 = vmatmul.mubr.msk.f32.vlgmr.msra.gmra.mrb[0].mxu0 %vm58_vm1, %v28_v3  ;;  %40 = vperm.xlu0 %455, %v34_v6   ;;  %v179_v12 = vld [vmem:[%s587_s4] sm:$0xff]  ;;  %v180_v13 = vld [vmem:[%s587_s4 + $0x8] sm:$0xff]  ;;  %v31_v14 = vld [vmem:[%s584_s1 + $0x18] sm:$0xff] }
   0x5   :  { %148 = vmatprep.mubr.f32.mxu0 %v457_v2  ;;  %50 = vperm.xlu1 %456, %v36_v7   ;;  %v181_v15 = vld [vmem:[%s587_s4 + $0x10] sm:$0xff]  ;;  %v182_v16 = vld [vmem:[%s587_s4 + $0x18] sm:$0xff]  ;;  %v175_v50 = vld [vmem:[%s588_s3] sm:$0xff] }
   0x6   :  { %v176_v51 = vld [vmem:[%s588_s3 + $0x8] sm:$0xff]  ;;  %v177_v52 = vld [vmem:[%s588_s3 + $0x10] sm:$0xff]  ;;  %v178_v53 = vld [vmem:[%s588_s3 + $0x18] sm:$0xff] }
   0x8   :  { %428 = vmatmul.mubr.msk.f32.gmra.mrb[2].mxu0 %vm58_vm1, %v29_v8  ;;  %45 = vperm.xlu0 %455, %v35_v9  }
   0x9   :  { %154 = vmatprep.mubr.f32.mxu0 %v457_v2  ;;  %55 = vperm.xlu1 %456, %v37_v10   ;;  %v314_v17 = vld [vmem:[#allocation2] sm:$0x1] }
   0xc   :  { %429 = vmatmul.mubr.msk.f32.gmra.mrb[4].mxu0 %vm58_vm1, %v30_v11  ;;  %185 = vperm.xlu0 %455, %v179_v12  }
   0xd   :  { %160 = vmatprep.mubr.f32.mxu0 %v457_v2  ;;  %190 = vperm.xlu1 %456, %v180_v13  }
  0x10   :  { %430 = vmatmul.mubr.msk.f32.gmra.mrb[6].mxu0 %vm58_vm1, %v31_v14  ;;  %195 = vperm.xlu0 %455, %v181_v15  }
  0x11   :  { %200 = vperm.xlu1 %456, %v182_v16   ;;  %391 = vmatprep.mubr.f32.mxu0 %v457_v2 }
  0x14   :  { %317 = vperm.xlu0 %455, %v314_v17  }
  0x83   :  { %v41_v18 = vpop.permute.xlu0 %40 }
  0x84   :  { %v51_v27 = vpop.permute.xlu1 %50 }
  0x87   :  { %v46_v22 = vpop.permute.xlu0 %45 }
  0x88   :  { %v56_v38 = vpop.permute.xlu1 %55 }
  0x8b   :  { %v186_v56 = vpop.permute.xlu0 %185 }
  0x8c   :  { %v191_v58 = vpop.permute.xlu1 %190 }
  0x8f   :  { %v196_v7 = vpop.permute.xlu0 %195 }
  0x90   :  { %v201_v10 = vpop.permute.xlu1 %200 }
  0xd7   :  { %v144_v19 = vpop.f32.mrb[0].mxu0 }
  0xd8   :  { %v146_v20 = vpop.f32.mrb[1].mxu0  ;;  %v145_v21 = vadd.f32 %v144_v19, %v41_v18 }
  0xd9   :  { %v147_v23 = vadd.f32 %v146_v20, %v41_v18 }
  0xda   :  { %v167_v29 = vmax.f32 %v145_v21, 0.0 }
  0xdb   :  { %v150_v24 = vpop.f32.mrb[2].mxu0  ;;  %v168_v31 = vmax.f32 %v147_v23, 0.0  ;;  %v320_v23 = vlaneseq }
  0xdc   :  { %v151_v25 = vadd.f32 %v150_v24, %v46_v22  ;;  %v152_v26 = vpop.f32.mrb[3].mxu0 }
  0xdd   :  { %v153_v28 = vadd.f32 %v152_v26, %v46_v22  ;;  %v313_v22 = vld [vmem:[%s589_s5] sm:$0x1]  ;;  %v321_v24 = vshrl.u32 %v320_v23, 7  ;;  %vm418_vm3 = vcmp.lt.s32.totalorder %v320_v23, 256 }
  0xde   :  { %v169_v30 = vmax.f32 %v151_v25, 0.0  ;;  %v459_v25 = vmov 1966171168  }
  0xdf   :  { %v170_v32 = vmax.f32 %v153_v28, 0.0  ;;  %v156_v33 = vpop.f32.mrb[4].mxu0  ;;  %v402_v26 = vunpack.c.l.s4 %v459_v25  ;;  %v318_v28 = vpop.permute.xlu0 %317 }
  0xe0   :  { %v158_v34 = vpop.f32.mrb[5].mxu0  ;;  %v438_v35 = vpack.c.bf16 %v169_v30, %v167_v29  ;;  %v157_v37 = vadd.f32 %v156_v33, %v51_v27 }
  0xe1   :  { %v436_v36 = vpack.c.bf16 %v170_v32, %v168_v31  ;;  %v159_v39 = vadd.f32 %v158_v34, %v51_v27  ;;  %v322_v27 = vsub.s32 0, %v321_v24  ;;  %v403_v29 = vunpack.c.0.s8 %v402_v26 }
  0xe2   :  { %v171_v44 = vmax.f32 %v157_v37, 0.0 }
  0xe3   :  { %v162_v40 = vpop.f32.mrb[6].mxu0  ;;  %437 = vmatprep.subr.bf16.mxu1 %v436_v36  ;;  %v172_v46 = vmax.f32 %v159_v39, 0.0  ;;  %v323_v30 = vrot.slane %v318_v28, %v322_v27 }
  0xe4   :  { %v163_v41 = vadd.f32 %v162_v40, %v56_v38  ;;  %v164_v42 = vpop.f32.mrb[7].mxu0  ;;  %439 = vmatpush1.bf16.msra.mxu1 %v438_v35  ;;  %v406_v35 = vsub.s32 %v403_v29, %v321_v24 }
  0xe5   :  { %v165_v43 = vadd.f32 %v164_v42, %v56_v38 }
  0xe6   :  { %v173_v45 = vmax.f32 %v163_v41, 0.0 }
  0xe7   :  { %v174_v47 = vmax.f32 %v165_v43, 0.0 }
  0xe8   :  { %v442_v48 = vpack.c.bf16 %v173_v45, %v171_v44 }
  0xe9   :  { %v440_v49 = vpack.c.bf16 %v174_v47, %v172_v46 }
  0xeb   :  { %441 = vmatprep.subr.bf16.mxu1 %v440_v49 }
  0xec   :  { %443 = vmatpush1.bf16.msra.mxu1 %v442_v48 }
  0xef   :  { %431 = vmatmul.mubr.msk.f32.vlgmr.msra.gmra.mrb[0].mxu1 %vm203_vm2, %v175_v50 }
  0xf0   :  { %286 = vmatprep.mubr.f32.mxu1 %v457_v2 }
  0xf3   :  { %432 = vmatmul.mubr.msk.f32.gmra.mrb[2].mxu1 %vm203_vm2, %v176_v51 }
  0xf4   :  { %292 = vmatprep.mubr.f32.mxu1 %v457_v2 }
  0xf7   :  { %433 = vmatmul.mubr.msk.f32.gmra.mrb[4].mxu1 %vm203_vm2, %v177_v52 }
  0xf8   :  { %298 = vmatprep.mubr.f32.mxu1 %v457_v2 }
  0xfb   :  { %434 = vmatmul.mubr.msk.f32.gmra.mrb[6].mxu1 %vm203_vm2, %v178_v53 }
 0x1c2   :  { %v282_v54 = vpop.f32.mrb[0].mxu1 }
 0x1c3   :  { %v284_v55 = vpop.f32.mrb[1].mxu1  ;;  %v283_v57 = vadd.f32 %v282_v54, %v186_v56 }
 0x1c4   :  { %v285_v59 = vadd.f32 %v284_v55, %v186_v56 }
 0x1c5   :  { %v305_v0 = vmax.f32 %v283_v57, 0.0 }
 0x1c6   :  { %v288_v60 = vpop.f32.mrb[2].mxu1  ;;  %v306_v3 = vmax.f32 %v285_v59, 0.0 }
 0x1c7   :  { %v289_v61 = vadd.f32 %v288_v60, %v191_v58  ;;  %v290_v62 = vpop.f32.mrb[3].mxu1 }
 0x1c8   :  { %v291_v63 = vadd.f32 %v290_v62, %v191_v58 }
 0x1c9   :  { %v307_v1 = vmax.f32 %v289_v61, 0.0 }
 0x1ca   :  { %v308_v2 = vmax.f32 %v291_v63, 0.0  ;;  %v294_v4 = vpop.f32.mrb[4].mxu1 }
 0x1cb   :  { %v446_v5 = vpack.c.bf16 %v307_v1, %v305_v0  ;;  %v296_v6 = vpop.f32.mrb[5].mxu1  ;;  %v295_v9 = vadd.f32 %v294_v4, %v196_v7 }
 0x1cc   :  { %v444_v8 = vpack.c.bf16 %v308_v2, %v306_v3  ;;  %v297_v11 = vadd.f32 %v296_v6, %v196_v7 }
 0x1cd   :  { %v309_v16 = vmax.f32 %v295_v9, 0.0 }
 0x1ce   :  { %v300_v12 = vpop.f32.mrb[6].mxu1  ;;  %445 = vmatprep.subr.bf16.mxu0 %v444_v8  ;;  %v310_v18 = vmax.f32 %v297_v11, 0.0 }
 0x1cf   :  { %v301_v13 = vadd.f32 %v300_v12, %v201_v10  ;;  %v302_v14 = vpop.f32.mrb[7].mxu1  ;;  %447 = vmatpush1.bf16.msra.mxu0 %v446_v5 }
 0x1d0   :  { %v303_v15 = vadd.f32 %v302_v14, %v201_v10 }
 0x1d1   :  { %v311_v17 = vmax.f32 %v301_v13, 0.0 }
 0x1d2   :  { %v312_v19 = vmax.f32 %v303_v15, 0.0 }
 0x1d3   :  { %v450_v20 = vpack.c.bf16 %v311_v17, %v309_v16 }
 0x1d4   :  { %v448_v21 = vpack.c.bf16 %v312_v19, %v310_v18 }
 0x1d6   :  { %449 = vmatprep.subr.bf16.mxu0 %v448_v21 }
 0x1d7   :  { %451 = vmatpush1.bf16.msra.mxu0 %v450_v20 }
 0x1da   :  { %435 = vmatmul.mubr.msk.f32.vlgmr.msra.gmra.mrb[8].mxu0 %vm203_vm2, %v313_v22 }
 0x2ad   :  { %v393_v31 = vpop.f32.mrb[8].mxu0 }
 0x2ae   :  { %v394_v32 = vadd.f32 %v393_v31, %v323_v30  ;;  %v395_v33 = vpop.f32.mrb[9].mxu0 }
 0x2af   :  { %v396_v34 = vadd.f32 %v395_v33, %v323_v30 }
 0x2b1   :  { %v400_v36 = vcombine.low %v394_v32, %v396_v34 }
 0x2b3   :  { %v407_v37 = vrot.slane %v400_v36, %v406_v35 }
 0x2b5   :  { %v414_v38 = vrot.slane %v407_v37, %v406_v35 }
 0x2b7   :  { %420 = vst.msk [vmem:[%s590_s7] sm:$0x3] %vm418_vm3, %v414_v38 }

</bundles_post_ra>
